<compile_context>
chip_gen: v6e
topology: v6e:2x2x1
jax: 0.10.0
libtpu: 0.0.40
codegen_flags: <defaults>
</compile_context>

<pallas_src>
import functools

import jax
import jax.numpy as jnp
from jax.experimental import pallas as pl
from jax.experimental.pallas import tpu as pltpu


def _score_kernel(h_ref, t_ref, r_ref, o_ref):
    # h_ref/t_ref: (1, tile_n, D); r_ref: (1, 1, D) or (1, tile_n, D); o_ref: (1, 1, tile_n)
    diff = (h_ref[...].astype(jnp.float32)
            + r_ref[...].astype(jnp.float32)      # broadcasts along the tile_n axis on-chip
            - t_ref[...].astype(jnp.float32))
    sq_sum = jnp.sum(diff * diff, axis=-1)         # XLU lane reduce -> (1, tile_n)
    o_ref[...] = (-jnp.sqrt(sq_sum)).reshape(o_ref.shape)   # EUP sqrt, lane-dense store


def _round_up(x, m):
    return ((x + m - 1) // m) * m


def _choose_tile_n(n, d, itemsize=4, max_block_bytes=2 * 1024 * 1024):
    """Largest row tile whose (tile_n, D) input block stays under the per-block VMEM budget.

    3 inputs x 2 pipeline buffers x 2 MiB = 12 MiB worst case, which fits every
    generation's scoped VMEM (we also raise vmem_limit_bytes to 48 MiB for headroom,
    still safe on v7x's 64 MiB physical VMEM).
    """
    cap = max(8, max_block_bytes // (d * itemsize))
    cap = (cap // 128) * 128 if cap >= 128 else (cap // 8) * 8
    if n <= cap:
        return _round_up(max(n, 1), 8)      # single tile along N (padded to sublane mult)
    return cap                               # multiple of 128 -> lane-dense output blocks


@functools.partial(jax.jit, static_argnums=(3,))
def embedding_learner_forward(h, t, r, pos_num):
    """h, t: [B, N, 1, D]; r: [B or 1, N or 1, 1, D] (PyTorch-style broadcast in h + r - t).

    Returns (p_score [B, pos_num], n_score [B, N - pos_num])."""
    B, N, one, D = h.shape
    assert one == 1 and t.shape == h.shape

    h3 = h.reshape(B, N, D).astype(jnp.float32)
    t3 = t.reshape(B, N, D).astype(jnp.float32)

    # Broadcast r over the batch axis only (tiny); keep the N axis un-broadcast whenever
    # possible so the kernel re-reads a single (1, D) relation row per batch instead of
    # streaming a materialized [B, N, D] copy from HBM.
    rb = jnp.broadcast_to(r, (B,) + r.shape[1:]).reshape(B, r.shape[1], D)
    rb = rb.astype(jnp.float32)
    r_shared = rb.shape[1] == 1
    if not r_shared:
        assert rb.shape[1] == N

    tile_n = _choose_tile_n(N, D)
    n_pad = _round_up(N, tile_n)
    if n_pad != N:
        pad = ((0, 0), (0, n_pad - N), (0, 0))
        h3 = jnp.pad(h3, pad)
        t3 = jnp.pad(t3, pad)
        if not r_shared:
            rb = jnp.pad(rb, pad)

    grid = (B, n_pad // tile_n)

    ht_spec = pl.BlockSpec((1, tile_n, D), lambda b, j: (b, j, 0))
    if r_shared:
        r_spec = pl.BlockSpec((1, 1, D), lambda b, j: (b, 0, 0))
    else:
        r_spec = pl.BlockSpec((1, tile_n, D), lambda b, j: (b, j, 0))

    score = pl.pallas_call(
        _score_kernel,
        out_shape=jax.ShapeDtypeStruct((B, 1, n_pad), jnp.float32),
        grid_spec=pltpu.PrefetchScalarGridSpec(
            num_scalar_prefetch=0,
            grid=grid,
            in_specs=[ht_spec, ht_spec, r_spec],
            out_specs=pl.BlockSpec((1, 1, tile_n), lambda b, j: (b, 0, j)),
        ),
        compiler_params=pltpu.CompilerParams(
            dimension_semantics=("parallel", "parallel"),
            vmem_limit_bytes=48 * 1024 * 1024,
        ),
    )(h3, t3, rb)

    score = score.reshape(B, n_pad)[:, :N]
    p_score = score[:, :pos_num]
    n_score = score[:, pos_num:]
    return p_score, n_score


if __name__ == "__main__":
    B, N, D = 2, 8, 32
    pos_num = 4

    key = jax.random.PRNGKey(0)
    kh, kt, kr = jax.random.split(key, 3)
    h = jax.random.normal(kh, (B, N, 1, D), dtype=jnp.float32)
    t = jax.random.normal(kt, (B, N, 1, D), dtype=jnp.float32)
    # Common MetaR-style case: one relation vector per batch, broadcast over N candidates.
    r_shared = jax.random.normal(kr, (B, 1, 1, D), dtype=jnp.float32)
    # Fully materialized per-candidate relation is also supported.
    r_full = jnp.broadcast_to(r_shared, (B, N, 1, D))

    for r in (r_shared, r_full):
        p_score, n_score = embedding_learner_forward(h, t, r, pos_num)
        jax.block_until_ready((p_score, n_score))

        # Reference check against plain-JAX semantics of the PyTorch forward.
        ref_score = -jnp.linalg.norm(h + r - t, ord=2, axis=-1).squeeze(2)
        ref_p, ref_n = ref_score[:, :pos_num], ref_score[:, pos_num:]
        assert p_score.shape == (B, pos_num) and n_score.shape == (B, N - pos_num)
        assert jnp.allclose(p_score, ref_p, atol=1e-5)
        assert jnp.allclose(n_score, ref_n, atol=1e-5)

    print("KERNEL_OK")
</pallas_src>

<mosaic_0001>
module attributes {stable_mosaic.version = 11 : i64} {
  func.func @_score_kernel(%arg0: i32, %arg1: i32, %arg2: memref<1x8x32xf32, #tpu.memory_space<vmem>>, %arg3: memref<1x8x32xf32, #tpu.memory_space<vmem>>, %arg4: memref<1x1x32xf32, #tpu.memory_space<vmem>>, %arg5: memref<1x1x8xf32, #tpu.memory_space<vmem>>) attributes {dimension_semantics = [#tpu.dimension_semantics<parallel>, #tpu.dimension_semantics<parallel>], iteration_bounds = array<i64: 2, 1>, scalar_prefetch = 0 : i64, scratch_operands = 0 : i64, tpu.core_type = #tpu.core_type<tc>, window_params = [{transform_indices = @transform_0, window_bounds = array<i64: 1, 8, 32>}, {transform_indices = @transform_1, window_bounds = array<i64: 1, 8, 32>}, {transform_indices = @transform_2, window_bounds = array<i64: 1, 1, 32>}, {transform_indices = @transform_3, window_bounds = array<i64: 1, 1, 8>}]} {
    %c0 = arith.constant 0 : index
    %c0_0 = arith.constant 0 : index
    %c0_1 = arith.constant 0 : index
    %0 = vector.load %arg2[%c0, %c0_0, %c0_1] : memref<1x8x32xf32, #tpu.memory_space<vmem>>, vector<1x8x32xf32>
    %c0_2 = arith.constant 0 : index
    %c0_3 = arith.constant 0 : index
    %c0_4 = arith.constant 0 : index
    %1 = vector.load %arg4[%c0_2, %c0_3, %c0_4] : memref<1x1x32xf32, #tpu.memory_space<vmem>>, vector<1x1x32xf32>
    %2 = vector.broadcast %1 : vector<1x1x32xf32> to vector<1x8x32xf32>
    %3 = arith.addf %0, %2 : vector<1x8x32xf32>
    %c0_5 = arith.constant 0 : index
    %c0_6 = arith.constant 0 : index
    %c0_7 = arith.constant 0 : index
    %4 = vector.load %arg3[%c0_5, %c0_6, %c0_7] : memref<1x8x32xf32, #tpu.memory_space<vmem>>, vector<1x8x32xf32>
    %5 = arith.subf %3, %4 : vector<1x8x32xf32>
    %6 = arith.mulf %5, %5 : vector<1x8x32xf32>
    %cst = arith.constant dense<0.000000e+00> : vector<1x8xf32>
    %7 = vector.multi_reduction <add>, %6, %cst [2] : vector<1x8x32xf32> to vector<1x8xf32>
    %8 = math.sqrt %7 : vector<1x8xf32>
    %cst_8 = arith.constant 0.000000e+00 : f32
    %9 = vector.broadcast %cst_8 : f32 to vector<1x8xf32>
    %10 = arith.subf %9, %8 : vector<1x8xf32>
    %11 = vector.shape_cast %10 : vector<1x8xf32> to vector<1x1x8xf32>
    %c0_9 = arith.constant 0 : index
    %c0_10 = arith.constant 0 : index
    %c0_11 = arith.constant 0 : index
    %12 = vector.load %arg5[%c0_9, %c0_10, %c0_11] : memref<1x1x8xf32, #tpu.memory_space<vmem>>, vector<1x1x8xf32>
    tpu.vector_store %arg5[%c0_9, %c0_10, %c0_11], %11 {strides = array<i32>} : memref<1x1x8xf32, #tpu.memory_space<vmem>>, vector<1x1x8xf32>,
    return
  }
  func.func @transform_0(%arg0: i32, %arg1: i32) -> (i32, i32, i32) {
    %c0_i32 = arith.constant 0 : i32
    %c0_i32_0 = arith.constant 0 : i32
    return %arg0, %arg1, %c0_i32 : i32, i32, i32
  }
  func.func @transform_1(%arg0: i32, %arg1: i32) -> (i32, i32, i32) {
    %c0_i32 = arith.constant 0 : i32
    %c0_i32_0 = arith.constant 0 : i32
    return %arg0, %arg1, %c0_i32 : i32, i32, i32
  }
  func.func @transform_2(%arg0: i32, %arg1: i32) -> (i32, i32, i32) {
    %c0_i32 = arith.constant 0 : i32
    %c0_i32_0 = arith.constant 0 : i32
    %c0_i32_1 = arith.constant 0 : i32
    return %arg0, %c0_i32, %c0_i32_0 : i32, i32, i32
  }
  func.func @transform_3(%arg0: i32, %arg1: i32) -> (i32, i32, i32) {
    %c0_i32 = arith.constant 0 : i32
    %c0_i32_0 = arith.constant 0 : i32
    return %arg0, %c0_i32, %arg1 : i32, i32, i32
  }
}

</mosaic_0001>

<bundles_post_ra>
// kernel: embedding_learner_forward.1
= control target key start
LH: loop header
LB: loop body
LE: loop exit
PB: predicated region body
PF: predicated region fallthrough
CT: control target
= control target key end

     0   :  { %8 = vsyncpa [#allocation3], 0  ;;  %s745_s0 = inlined_call_operand.hbm [shape: f32[2,8,32], index: 0, kind: input, shape index: {}]   ;;  %s746_s1 = inlined_call_operand.hbm [shape: f32[2,8,32], index: 1, kind: input, shape index: {}]   ;;  %s747_s2 = inlined_call_operand.vmem [shape: f32[2,1,32], index: 2, kind: input, shape index: {}]   ;;  %s748_s3 = inlined_call_operand.vmem [shape: f32[2,1,8], index: 3, kind: output, shape index: {}]  }
   0x1   :  { %10 = vsyncpa [#allocation3 + $0x1], 0 }
   0x2   :  { %11 = vsyncpa [#allocation5], 0 }
   0x3   :  { %13 = vsyncpa [#allocation5 + $0x1], 0  ;;  %s616_s12 = smov 0   ;;  %s618_s13 = smov 0  }
   0x4   :  { %s620_s14 = smov 0   ;;  %s622_s15 = smov 0  }
   0x5   :  { %s624_s16 = smov 0   ;;  %s626_s17 = smov 0  }
   0x6 LB: > { %s406_s18 = sadd.s32 4294967295, %s592_s17   ;;  %s31_s19 = sadd.s32 1, %s588_s16  ;;  %s592_s17 = sphi %s626_s17, %s19_s17   ;;  %s588_s16 = sphi %s624_s16, %s757_s16   ;;  %s584_s15 = sphi %s622_s15, %s756_s15   ;;  %s580_s14 = sphi %s620_s14, %s755_s14   ;;  %s576_s13 = sphi %s618_s13, %s754_s13   ;;  %s572_s12 = sphi %s616_s12, %s753_s12  }
   0x7   : > { %p33_p0 = scmp.ge.s32.totalorder %s31_s19, 2  ;;  %s40_s20 = sadd.s32 1, %s580_s14 }
   0x8   : > { %p47_p1 = scmp.ne.s32.totalorder %s580_s14, %s576_s13  ;;  %p48_p2 = scmp.eq.s32.totalorder %s592_s17, 0 }
   0x9   : > { %s759_s19 = smov (%p33_p0, %s31_s19), 0  ;;  %p53_p4 = scmp.ne.s32.totalorder %s576_s13, %s572_s12 }
   0xa   : > { %p652_p3 = por %p48_p2, %p47_p1  ;;  %s35_s22 = ssub.s32 %s588_s16, %s759_s19 }
   0xb   : > { %p54_p5 = scmp.eq.s32.totalorder %s406_s18, 0  ;;  %p38_p6 = scmp.eq.s32.totalorder %s35_s22, 0 }
   0xc   : > { %p431_p8 = scmp.lt.s32.totalorder %s592_s17, 2  ;;  %s668_s25 = sand.u32 1, %s580_s14  }
   0xd   : > { %p659_p7 = por %p54_p5, %p53_p4  ;;  %s411_s26 = sshll.u32 %s588_s16, 7 }
   0xe   : > { %s665_s24 = scalar_select %p38_p6, %s580_s14, %s40_s20  }
   0xf   : > { %s410_s27 = sshll.u32 %s668_s25, 3  ;;  %s169_s30 = scalar_lea.hbm %s745_s0, %s411_s26 }
  0x10   : > { %s163_s4 = scalar_lea.vmem [#allocation2], %s410_s27  ;;  %p677_p9 = pnand %p431_p8, %p652_p3 }
  0x11   : > { %s171_s5 = sshll.u32 %s163_s4, 4  ;;  %p414_p10 = scmp.ge.s32.totalorder %s592_s17, 1  ;;  %s172_s5 = int_to_ptr.vmem [resolvable:$true] %s171_s5 }
  0x12   : > { %p201_p11 = scmp.lt.s32.totalorder %s592_s17, 3  ;;  %s160_s7 = scalar_lea.sflag [#allocation3], %s668_s25 }
  0x13   : > { %p484_p12 = pneg %p677_p9  ;;  %s495_s8 = scalar_lea.vmem %s172_s5, 128 }
  0x14   : > { %p496_p13 = scmp.ne.s32.totalorder %s172_s5, %s495_s8  ;;  %s594_s9 = smov [#allocation2]  }
  0x15   : > { %s500_s10 = sshll.u32 %s594_s9, 4  ;;  %s501_s10 = int_to_ptr.vmem [resolvable:$false] %s500_s10 }
  0x16   : > { %p498_p0 = pnand %p496_p13, %p484_p12  ;;  %s502_s11 = scalar_lea.vmem %s501_s10, 256 }
  0x17   : > { %p503_p2 = scmp.lt.s32.totalorder %s172_s5, %s501_s10  ;;  %p504_p3 = scmp.lt.s32.totalorder %s502_s11, %s495_s8 }
  0x18   : > { %p499_p1 = pneg %p498_p0 }
  0x19   : > { %p505_p4 = por %p504_p3, %p503_p2 }
  0x1b   : > { %p506_p5 = pnand %p505_p4, %p499_p1 }
  0x1d   : > { %509 = shalt.err (!%p506_p5)
}
  0x1e   : > { %427 = dma.hbm_to_vmem [thread:$0]  (!%p677_p9), %s169_s30, 128, %s172_s5, %s160_s7  }
  0x1f   : > { %p695_p6 = pnand %p414_p10, %p201_p11  ;;  %s188_s21 = scalar_lea.hbm %s746_s1, %s411_s26 }
  0x20   : > { %s182_s22 = scalar_lea.vmem [#allocation4], %s410_s27  ;;  %s179_s29 = scalar_lea.sflag [#allocation5], %s668_s25 }
  0x21   : > { %s190_s28 = sshll.u32 %s182_s22, 4  ;;  %s595_s30 = smov [#allocation4]   ;;  %s191_s28 = int_to_ptr.vmem [resolvable:$true] %s190_s28 }
  0x22   : > { %s523_s4 = scalar_lea.vmem %s191_s28, 128  ;;  %s528_s5 = sshll.u32 %s595_s30, 4  ;;  %s529_s5 = int_to_ptr.vmem [resolvable:$false] %s528_s5 }
  0x23   : > { %p524_p8 = scmp.ne.s32.totalorder %s191_s28, %s523_s4  ;;  %s530_s7 = scalar_lea.vmem %s529_s5, 256 }
  0x24   : > { %p531_p10 = scmp.lt.s32.totalorder %s191_s28, %s529_s5  ;;  %p532_p11 = scmp.lt.s32.totalorder %s530_s7, %s523_s4 }
  0x25   : > { %p526_p13 = pnand %p524_p8, %p484_p12 }
  0x26   : > { %p533_p1 = por %p532_p11, %p531_p10 }
  0x27   : > { %p527_p0 = pneg %p526_p13 }
  0x29   : > { %p534_p2 = pnand %p533_p1, %p527_p0 }
  0x2b   : > { %537 = shalt.err (!%p534_p2)
}
  0x2c   : > { %430 = dma.hbm_to_vmem [thread:$0]  (!%p677_p9), %s188_s21, 128, %s191_s28, %s179_s29  }
  0x2d   : > { %205 = sbr.rel (%p695_p6) target bundleno = 226 (0xe2), region = 32  ;;  %s207_s25 = sand.u32 (!%p695_p6), 1, %s576_s13  }
  0x2e   : > { %s415_s26 = sshll.u32 (!%p695_p6), %s207_s25, 3  ;;  %s208_s27 = scalar_lea.sflag (!%p695_p6), [#allocation3], %s207_s25 }
  0x2f   : > { %s211_s8 = scalar_lea.vmem (!%p695_p6), [#allocation2], %s415_s26 }
  0x32   : > { %563 = dma.done.wait (%p659_p7), %s208_s27, 128  }
  0x33   : > { %565 = vsyncadd (%p659_p7), %s208_s27, 4294967168  ;;  %s217_s9 = scalar_lea.sflag [#allocation5], %s207_s25  ;;  %s220_s10 = scalar_lea.vmem [#allocation4], %s415_s26 }
  0x34   : > { %567 = dma.done.wait (%p659_p7), %s217_s9, 128  }
  0x35   : > { %569 = vsyncadd (%p659_p7), %s217_s9, 4294967168  ;;  %p252_p9 = scmp.lt.s32.totalorder %s584_s15, 1  ;;  %v261_v0 = vld [vmem:[%s211_s8] sm:$0xff]  ;;  %v270_v2 = vld [vmem:[%s220_s10] sm:$0xff]  ;;  %vm273_vm0 = vcmask 261120   ;;  %v286_v8 = vlaneseq  ;;  %vm293_vm3 = vcmask 57344  }
  0x37   : > { %s761_s15 = smov (!%p252_p9, %s584_s15), 1  ;;  %v287_v9 = vand.u32 127, %v286_v8  ;;  %v289_v10 = vshrl.u32 %v286_v8, 7 }
  0x38   : > { %s254_s12 = scalar_lea.vmem %s747_s2, %s761_s15  ;;  %s260_s20 = scalar_lea.vmem %s748_s3, %s761_s15 }
  0x39   : > { %v417_v1 = vld [vmem:[%s254_s12] ss:$0 sm:$0xff]  ;;  %v290_v15 = vsub.s32 %v287_v9, %v289_v10 }
  0x3a   : > { %v269_v3 = vadd.f32 %v417_v1, %v261_v0 }
  0x3c   : > { %v271_v4 = vsub.f32 %v269_v3, %v270_v2 }
  0x3e   : > { %v272_v5 = vmul.f32 %v271_v4, %v271_v4 }
  0x40   : > { %v274_v6 = vsel %vm273_vm0, %v272_v5, 0.0 }
  0x41   : > { %275 = vadd.xlane.f32.xlu0 %v274_v6 }
  0xca   : > { %v276_v7 = vpop.xlane.xlu0 %275 }
  0xcb   : > { %480 = vrsqrt.f32 %v276_v7  ;;  %vm279_vm1 = vcmp.eq.f32.partialorder %v276_v7, inf  ;;  %v282_v13 = vand.u32 2147483648, %v276_v7  ;;  %vm281_vm2 = vcmp.eq.f32.partialorder %v276_v7, 0.0 }
  0xd8   : > { %v481_v11 = vpop.eup %480 }
  0xd9   : > { %v278_v12 = vmul.f32 %v481_v11, %v276_v7 }
  0xdb   : > { %v280_v14 = vsel %vm279_vm1, %v276_v7, %v278_v12 }
  0xdc   : > { %v283_v16 = vsel %vm281_vm2, %v282_v13, %v280_v14 }
  0xdd   : > { %v284_v17 = vsub.f32 0.0, %v283_v16 }
  0xdf   : > { %v291_v18 = vrot.slane %v284_v17, %v290_v15 }
  0xe1   : > { %294 = vst.msk [vmem:[%s260_s20] sm:$0x1] %vm293_vm3, %v291_v18 }
  0xe2 PF: > { %s19_s17 = sadd.s32 1, %s592_s17   ;;  %s753_s12 = smov %s576_s13 }
  0xe3   : > { %p16_p7 = scmp.ge.s32.totalorder %s19_s17, 4   ;;  %s754_s13 = smov %s580_s14 }
  0xe4   : > { %s755_s14 = smov %s665_s24  ;;  %s756_s15 = smov %s588_s16 }
  0xe5   : > { %s757_s16 = smov %s759_s19  ;;  %18 = sbr.rel (!%p16_p7) target bundleno = 6 (0x6), region = 88 }
  0xea   :  { %318 = vsyncpa [#allocation3], 1 }
  0xeb   :  { %320 = vsyncpa [#allocation3 + $0x1], 1 }
  0xec   :  { %321 = vsyncpa [#allocation5], 1 }
  0xed   :  { %323 = vsyncpa [#allocation5 + $0x1], 1 }

</bundles_post_ra>
